<compile_context>
chip_gen: v6e
topology: v6e:2x2x1
jax: 0.10.0
libtpu: 0.0.40
codegen_flags: <defaults>
</compile_context>

<pallas_src>
import jax
import jax.numpy as jnp
from jax.experimental import pallas as pl
from jax.experimental.pallas import tpu as pltpu


def _cdiv(a, b):
    return -(-a // b)


def _round_up(n, m):
    return _cdiv(n, m) * m


def _vmem_capacity_bytes():
    """Physical per-core VMEM (128 MiB v5e/v6e, 64 MiB v7x); safe fallback."""
    try:
        info = pltpu.get_tpu_info()
        cap = getattr(info, "vmem_capacity_bytes", None)
        if cap:
            return int(cap)
    except Exception:
        pass
    return 64 << 20  # conservative (v7x per-TensorCore VMEM)


def _vmem_estimate(tm, ti, H, act_bytes, w_bytes, nbuf=2):
    """Rough VMEM usage of one grid step (double-buffered tiles + accumulator)."""
    return (nbuf * tm * H * act_bytes          # x tiles
            + nbuf * tm * H * act_bytes        # out tiles
            + nbuf * H * 2 * ti * w_bytes      # fused gate/up weight tiles
            + nbuf * ti * H * w_bytes          # down-projection weight tiles
            + tm * H * 4)                      # f32 accumulator scratch


def _pick_ti(I):
    """Largest 128-multiple intermediate tile that divides I."""
    for ti in (512, 384, 256, 128):
        if I % ti == 0:
            return ti
    return I  # tiny models: single tile


def _pick_tm(H, ti, act_bytes, w_bytes, budget):
    """Largest token tile whose working set fits the VMEM budget.

    Arithmetic intensity ~= tm FLOPs per weight byte; v6e needs ~650, v7x ~311,
    v5e ~240 to be MXU-bound, so prefer the biggest tm that fits.
    """
    for tm in (1024, 768, 512, 384, 256, 128):
        if _vmem_estimate(tm, ti, H, act_bytes, w_bytes) <= budget:
            return tm
    return 128


def _llama_mlp_kernel(x_ref, wgu_ref, wd_ref, o_ref, acc_ref):
    """One (token tile, intermediate tile) step of the fused MLP.

    x_ref  : (tm, H)       token tile (resident across the k axis)
    wgu_ref: (H, 2*ti)     fused [gate_k | up_k] weight tile (contiguous in HBM)
    wd_ref : (ti, H)       down-projection weight tile
    o_ref  : (tm, H)       output tile (written on the last k step)
    acc_ref: (tm, H) f32   VMEM accumulator scratch
    """
    ti = wd_ref.shape[0]
    k = pl.program_id(1)

    @pl.when(k == 0)
    def _init():
        acc_ref[...] = jnp.zeros_like(acc_ref)

    x = x_ref[...]
    # Single wide MXU pass produces both gate and up for this intermediate tile.
    gu = jnp.dot(x, wgu_ref[...], preferred_element_type=jnp.float32)
    gate = gu[:, :ti]
    up = gu[:, ti:]
    # Exact SiLU(g) * up; exp runs on the EUP, negligible vs the MXU work.
    h = gate * (1.0 / (1.0 + jnp.exp(-gate))) * up
    # Partial down projection, accumulated in f32; h cast to the weight dtype
    # so a bf16 weight path stays bf16 on the MXU.
    acc_ref[...] += jnp.dot(h.astype(wd_ref.dtype), wd_ref[...],
                            preferred_element_type=jnp.float32)

    @pl.when(k == pl.num_programs(1) - 1)
    def _store():
        o_ref[...] = acc_ref[...].astype(o_ref.dtype)


def prepare_llama_mlp_weights(gate_up_proj_w, down_proj_w, *, ti, dtype=None):
    """One-time (load-time) weight re-layout; no per-call HBM transposes.

    gate_up_proj_w: (2I, H)  torch nn.Linear layout (out_features, in_features)
    down_proj_w   : (H, I)   torch nn.Linear layout
    Returns:
      wgu: (nk, H, 2*ti) -- reduction tile k is the contiguous block
           wgu[k] = [gate_k | up_k], so each grid step is one contiguous DMA.
      wd : (I, H)
    """
    H, I = down_proj_w.shape
    assert gate_up_proj_w.shape == (2 * I, H)
    assert I % ti == 0, "intermediate_size must be divisible by ti"
    nk = I // ti
    wg = jnp.transpose(gate_up_proj_w[:I, :])   # (H, I)
    wu = jnp.transpose(gate_up_proj_w[I:, :])   # (H, I)
    wgu = jnp.concatenate(
        [wg.reshape(H, nk, ti), wu.reshape(H, nk, ti)], axis=-1)   # (H, nk, 2ti)
    wgu = jnp.transpose(wgu, (1, 0, 2))          # (nk, H, 2*ti), tile-contiguous
    wd = jnp.transpose(down_proj_w)              # (I, H)
    if dtype is not None:
        wgu = wgu.astype(dtype)
        wd = wd.astype(dtype)
    return wgu, wd


def llama_mlp_fused(x, wgu, wd, *, tm=None, vmem_limit_bytes=None):
    """x: (..., H); wgu: (nk, H, 2*ti) tile-contiguous; wd: (I, H).

    tm=None auto-picks the largest token tile that fits ~70% of physical VMEM
    (-> ~1024 on 128 MiB v5e/v6e, ~384-512 on 64 MiB v7x). Keep tm >= 256 on
    all generations when overriding (tm ~= FLOPs/byte; smaller is HBM-bound).
    """
    H = x.shape[-1]
    nk, H_w, two_ti = wgu.shape
    ti = two_ti // 2
    I = nk * ti
    assert H_w == H and two_ti == 2 * ti
    assert wd.shape == (I, H)
    assert ti % 128 == 0 or ti == I, \
        "ti must be a multiple of 128 (lane alignment for the gate/up split)"

    orig_shape = x.shape
    xt = x.reshape(-1, H)
    T = xt.shape[0]

    act_bytes = jnp.dtype(x.dtype).itemsize
    w_bytes = jnp.dtype(wgu.dtype).itemsize
    # dtype-aware sublane packing: f32 -> 8, bf16 -> 16, int8/fp8 -> 32
    sub = 8 * max(1, 4 // act_bytes)

    cap = _vmem_capacity_bytes()
    if tm is None:
        tm = _pick_tm(H, ti, act_bytes, w_bytes, budget=int(0.70 * cap))

    # Balanced token tiles: avoid paying an almost-empty extra tile of weight
    # streaming when T is just above a multiple of tm.
    ntiles = _cdiv(T, tm)
    tm_eff = _round_up(_cdiv(T, ntiles), sub)
    T_pad = ntiles * tm_eff
    if T_pad != T:
        xt = jnp.pad(xt, ((0, T_pad - T), (0, 0)))

    if vmem_limit_bytes is None:
        est = _vmem_estimate(tm_eff, ti, H, act_bytes, w_bytes)
        # Generation-aware ceiling: never exceed 85% of physical VMEM.
        vmem_limit_bytes = int(min(max(est * 5 // 4, 32 << 20), int(0.85 * cap)))

    out = pl.pallas_call(
        _llama_mlp_kernel,
        out_shape=jax.ShapeDtypeStruct((T_pad, H), x.dtype),
        grid_spec=pltpu.PrefetchScalarGridSpec(
            num_scalar_prefetch=0,
            grid=(ntiles, nk),
            in_specs=[
                # token tile, resident across the reduction axis
                pl.BlockSpec((tm_eff, H), lambda i, k: (i, 0)),
                # fused gate/up weight tile: one contiguous (H, 2*ti) block
                pl.BlockSpec((None, H, 2 * ti), lambda i, k: (k, 0, 0)),
                # down-projection weight tile (contiguous rows)
                pl.BlockSpec((ti, H), lambda i, k: (k, 0)),
            ],
            out_specs=pl.BlockSpec((tm_eff, H), lambda i, k: (i, 0)),
            scratch_shapes=[pltpu.VMEM((tm_eff, H), jnp.float32)],
        ),
        compiler_params=pltpu.CompilerParams(
            dimension_semantics=("parallel", "arbitrary"),
            vmem_limit_bytes=vmem_limit_bytes,
        ),
    )(xt, wgu, wd)

    if T_pad != T:
        out = out[:T]
    return out.reshape(orig_shape)


def llama_mlp(x, gate_up_proj_w, down_proj_w, *, tm=None, ti=None, dtype=None):
    """Convenience wrapper taking torch-layout weights.  In production, call
    prepare_llama_mlp_weights ONCE at load time (bf16 recommended) instead of
    per forward pass."""
    I = down_proj_w.shape[-1]
    if ti is None:
        ti = _pick_ti(I)
    wgu, wd = prepare_llama_mlp_weights(gate_up_proj_w, down_proj_w,
                                        ti=ti, dtype=dtype)
    return llama_mlp_fused(x, wgu, wd, tm=tm)


def llama_mlp_ref(x, gate_up_proj_w, down_proj_w):
    I = down_proj_w.shape[-1]
    gate_up = x @ gate_up_proj_w.T
    gate, up = gate_up[..., :I], gate_up[..., I:]
    return (jax.nn.silu(gate) * up) @ down_proj_w.T


if __name__ == "__main__":
    # Small but tile-friendly shapes so both grid axes (token tiles and the
    # intermediate reduction with its f32 accumulator) are exercised.
    batch, seq, hidden, intermediate = 2, 8, 256, 512

    key = jax.random.PRNGKey(0)
    kx, kg, kd = jax.random.split(key, 3)

    x = jax.random.normal(kx, (batch, seq, hidden), dtype=jnp.float32)
    # torch nn.Linear layout: (out_features, in_features)
    gate_up_w = jax.random.normal(kg, (2 * intermediate, hidden),
                                  dtype=jnp.float32) * 0.05
    down_w = jax.random.normal(kd, (hidden, intermediate),
                               dtype=jnp.float32) * 0.05

    ref = llama_mlp_ref(x, gate_up_w, down_w)

    # --- f32 path, explicit small tiles: ti=256 -> two reduction steps ---
    wgu32, wd32 = prepare_llama_mlp_weights(gate_up_w, down_w, ti=256)
    out = jax.block_until_ready(llama_mlp_fused(x, wgu32, wd32, tm=256))
    assert out.shape == ref.shape == (batch, seq, hidden)
    assert jnp.allclose(out, ref, atol=1e-2, rtol=1e-2), "f32 mismatch vs reference"

    # --- bf16 path (production dtype) with auto tile / VMEM selection ---
    x_bf16 = x.astype(jnp.bfloat16)
    wgu16, wd16 = prepare_llama_mlp_weights(
        gate_up_w.astype(jnp.bfloat16), down_w.astype(jnp.bfloat16), ti=256)
    out_bf16 = jax.block_until_ready(llama_mlp_fused(x_bf16, wgu16, wd16))
    ref_bf16 = llama_mlp_ref(
        x_bf16.astype(jnp.float32),
        gate_up_w.astype(jnp.bfloat16).astype(jnp.float32),
        down_w.astype(jnp.bfloat16).astype(jnp.float32))
    assert jnp.allclose(out_bf16.astype(jnp.float32), ref_bf16,
                        atol=5e-2, rtol=5e-2), "bf16 mismatch vs reference"

    # --- ragged token count (not a tile multiple): balanced pad/slice path ---
    x2 = x[:, :5, :]
    out2 = jax.block_until_ready(llama_mlp_fused(x2, wgu32, wd32, tm=256))
    ref2 = llama_mlp_ref(x2, gate_up_w, down_w)
    assert jnp.allclose(out2, ref2, atol=1e-2, rtol=1e-2), "ragged mismatch"

    # --- convenience wrapper straight from torch-layout weights ---
    out3 = jax.block_until_ready(llama_mlp(x, gate_up_w, down_w))
    assert jnp.allclose(out3, ref, atol=1e-2, rtol=1e-2), "wrapper mismatch"

    print("KERNEL_OK")
</pallas_src>

<mosaic_0001>
module attributes {stable_mosaic.version = 11 : i64} {
  func.func @_llama_mlp_kernel(%arg0: i32, %arg1: i32, %arg2: memref<16x256xf32, #tpu.memory_space<vmem>>, %arg3: memref<1x256x512xf32, #tpu.memory_space<vmem>>, %arg4: memref<256x256xf32, #tpu.memory_space<vmem>>, %arg5: memref<16x256xf32, #tpu.memory_space<vmem>>, %arg6: memref<16x256xf32, #tpu.memory_space<vmem>>) attributes {dimension_semantics = [#tpu.dimension_semantics<parallel>, #tpu.dimension_semantics<arbitrary>], iteration_bounds = array<i64: 1, 2>, scalar_prefetch = 0 : i64, scratch_operands = 1 : i64, tpu.core_type = #tpu.core_type<tc>, window_params = [{transform_indices = @transform_0, window_bounds = array<i64: 16, 256>}, {transform_indices = @transform_1, window_bounds = array<i64: 1, 256, 512>}, {transform_indices = @transform_2, window_bounds = array<i64: 256, 256>}, {transform_indices = @transform_3, window_bounds = array<i64: 16, 256>}]} {
    %c0_i32 = arith.constant 0 : i32
    %0 = arith.cmpi eq, %arg1, %c0_i32 : i32
    %1 = arith.extui %0 : i1 to i32
    %c0_i32_0 = arith.constant 0 : i32
    %2 = arith.cmpi ne, %1, %c0_i32_0 : i32
    scf.if %2 {
      %cst_16 = arith.constant 0.000000e+00 : f32
      %26 = vector.broadcast %cst_16 : f32 to vector<16x256xf32>
      %c0_17 = arith.constant 0 : index
      %c0_18 = arith.constant 0 : index
      %27 = vector.load %arg6[%c0_17, %c0_18] : memref<16x256xf32, #tpu.memory_space<vmem>>, vector<16x256xf32>
      tpu.vector_store %arg6[%c0_17, %c0_18], %26 {strides = array<i32>} : memref<16x256xf32, #tpu.memory_space<vmem>>, vector<16x256xf32>,
    } else {
    }
    %c0 = arith.constant 0 : index
    %c0_1 = arith.constant 0 : index
    %3 = vector.load %arg2[%c0, %c0_1] : memref<16x256xf32, #tpu.memory_space<vmem>>, vector<16x256xf32>
    %c0_2 = arith.constant 0 : index
    %c0_3 = arith.constant 0 : index
    %c0_4 = arith.constant 0 : index
    %4 = vector.load %arg3[%c0_2, %c0_3, %c0_4] : memref<1x256x512xf32, #tpu.memory_space<vmem>>, vector<1x256x512xf32>
    %5 = vector.shape_cast %4 : vector<1x256x512xf32> to vector<256x512xf32>
    %cst = arith.constant dense<0.000000e+00> : vector<16x512xf32>
    %6 = tpu.matmul %3, %5, %cst {dimension_numbers = #tpu.dot_dimension_numbers<[1], [0], [0], [1], [0, 0, 1, 1], [], []>} : vector<16x256xf32>, vector<256x512xf32>, vector<16x512xf32> -> vector<16x512xf32>
    %7 = vector.extract_strided_slice %6 {offsets = [0, 0], sizes = [16, 256], strides = [1, 1]} : vector<16x512xf32> to vector<16x256xf32>
    %8 = vector.extract_strided_slice %6 {offsets = [0, 256], sizes = [16, 256], strides = [1, 1]} : vector<16x512xf32> to vector<16x256xf32>
    %cst_5 = arith.constant 0.000000e+00 : f32
    %9 = vector.broadcast %cst_5 : f32 to vector<16x256xf32>
    %10 = arith.subf %9, %7 : vector<16x256xf32>
    %11 = math.exp %10 : vector<16x256xf32>
    %cst_6 = arith.constant 1.000000e+00 : f32
    %12 = vector.broadcast %cst_6 : f32 to vector<16x256xf32>
    %13 = arith.addf %12, %11 : vector<16x256xf32>
    %cst_7 = arith.constant 1.000000e+00 : f32
    %14 = vector.broadcast %cst_7 : f32 to vector<16x256xf32>
    %15 = arith.divf %14, %13 : vector<16x256xf32>
    %16 = arith.mulf %7, %15 : vector<16x256xf32>
    %17 = arith.mulf %16, %8 : vector<16x256xf32>
    %c0_8 = arith.constant 0 : index
    %c0_9 = arith.constant 0 : index
    %18 = vector.load %arg6[%c0_8, %c0_9] : memref<16x256xf32, #tpu.memory_space<vmem>>, vector<16x256xf32>
    %c0_10 = arith.constant 0 : index
    %c0_11 = arith.constant 0 : index
    %19 = vector.load %arg4[%c0_10, %c0_11] : memref<256x256xf32, #tpu.memory_space<vmem>>, vector<256x256xf32>
    %cst_12 = arith.constant dense<0.000000e+00> : vector<16x256xf32>
    %20 = tpu.matmul %17, %19, %cst_12 {dimension_numbers = #tpu.dot_dimension_numbers<[1], [0], [0], [1], [0, 0, 1, 1], [], []>} : vector<16x256xf32>, vector<256x256xf32>, vector<16x256xf32> -> vector<16x256xf32>
    %21 = arith.addf %18, %20 : vector<16x256xf32>
    %c0_13 = arith.constant 0 : index
    %c0_14 = arith.constant 0 : index
    %22 = vector.load %arg6[%c0_13, %c0_14] : memref<16x256xf32, #tpu.memory_space<vmem>>, vector<16x256xf32>
    tpu.vector_store %arg6[%c0_13, %c0_14], %21 {strides = array<i32>} : memref<16x256xf32, #tpu.memory_space<vmem>>, vector<16x256xf32>,
    %c1_i32 = arith.constant 1 : i32
    %23 = arith.cmpi eq, %arg1, %c1_i32 : i32
    %24 = arith.extui %23 : i1 to i32
    %c0_i32_15 = arith.constant 0 : i32
    %25 = arith.cmpi ne, %24, %c0_i32_15 : i32
    scf.if %25 {
      %c0_16 = arith.constant 0 : index
      %c0_17 = arith.constant 0 : index
      %26 = vector.load %arg6[%c0_16, %c0_17] : memref<16x256xf32, #tpu.memory_space<vmem>>, vector<16x256xf32>
      %c0_18 = arith.constant 0 : index
      %c0_19 = arith.constant 0 : index
      %27 = vector.load %arg5[%c0_18, %c0_19] : memref<16x256xf32, #tpu.memory_space<vmem>>, vector<16x256xf32>
      tpu.vector_store %arg5[%c0_18, %c0_19], %26 {strides = array<i32>} : memref<16x256xf32, #tpu.memory_space<vmem>>, vector<16x256xf32>,
    } else {
    }
    return
  }
  func.func @transform_0(%arg0: i32, %arg1: i32) -> (i32, i32) {
    %c0_i32 = arith.constant 0 : i32
    %c0_i32_0 = arith.constant 0 : i32
    return %arg0, %c0_i32 : i32, i32
  }
  func.func @transform_1(%arg0: i32, %arg1: i32) -> (i32, i32, i32) {
    %c0_i32 = arith.constant 0 : i32
    %c0_i32_0 = arith.constant 0 : i32
    %c0_i32_1 = arith.constant 0 : i32
    return %arg1, %c0_i32, %c0_i32_0 : i32, i32, i32
  }
  func.func @transform_2(%arg0: i32, %arg1: i32) -> (i32, i32) {
    %c0_i32 = arith.constant 0 : i32
    %c0_i32_0 = arith.constant 0 : i32
    return %arg1, %c0_i32 : i32, i32
  }
  func.func @transform_3(%arg0: i32, %arg1: i32) -> (i32, i32) {
    %c0_i32 = arith.constant 0 : i32
    %c0_i32_0 = arith.constant 0 : i32
    return %arg0, %c0_i32 : i32, i32
  }
}

</mosaic_0001>

<bundles_post_ra>
// kernel: tpu_custom_call.1
= control target key start
LH: loop header
LB: loop body
LE: loop exit
PB: predicated region body
PF: predicated region fallthrough
CT: control target
= control target key end

     0   :  { %8 = vsyncpa [#allocation4], 0  ;;  %s1601_s0 = inlined_call_operand.hbm [shape: f32[16,256], index: 0, kind: input, shape index: {}]   ;;  %s1602_s1 = inlined_call_operand.hbm [shape: f32[2,256,512], index: 1, kind: input, shape index: {}]   ;;  %s1603_s2 = inlined_call_operand.hbm [shape: f32[512,256], index: 2, kind: input, shape index: {}]   ;;  %s1604_s3 = inlined_call_operand.hbm [shape: f32[16,256], index: 3, kind: output, shape index: {}]  }
   0x1   :  { %9 = vsyncpa [#allocation7], 0 }
   0x2   :  { %11 = vsyncpa [#allocation7 + $0x1], 0 }
   0x3   :  { %12 = vsyncpa [#allocation5], 0  ;;  %s1244_s12 = smov 0   ;;  %s1246_s13 = smov 0  }
   0x4   :  { %s1248_s14 = smov 0   ;;  %s1250_s15 = smov 0  }
   0x5   :  { %s1252_s16 = smov 0   ;;  %s1254_s17 = smov 0  }
   0x6 LB: > { %s27_s18 = sadd.s32 1, %s1207_s16  ;;  %s63_s19 = sadd.s32 1, %s1199_s14  ;;  %s1211_s17 = sphi %s1254_s17, %s18_s17   ;;  %s1207_s16 = sphi %s1252_s16, %s1613_s16   ;;  %s1203_s15 = sphi %s1250_s15, %s1612_s15   ;;  %s1199_s14 = sphi %s1248_s14, %s1611_s14   ;;  %s1195_s13 = sphi %s1246_s13, %s1610_s13   ;;  %s1191_s12 = sphi %s1244_s12, %s1609_s12  }
   0x7   : > { %p28_p0 = scmp.ge.s32.totalorder %s27_s18, 2  ;;  %p70_p1 = scmp.ne.s32.totalorder %s1199_s14, %s1195_s13 }
   0x8   : > { %p71_p2 = scmp.eq.s32.totalorder %s1211_s17, 0  ;;  %p970_p4 = scmp.lt.s32.totalorder %s1211_s17, 2 }
   0x9   : > { %s1615_s18 = smov (%p28_p0, %s27_s18), 0  ;;  %s169_s21 = sand.u32 1, %s1211_s17  }
   0xa   : > { %p72_p3 = por %p71_p2, %p70_p1  ;;  %s60_s20 = ssub.s32 %s1207_s16, %s1615_s18 }
   0xb   : > { %p61_p5 = scmp.eq.s32.totalorder %s60_s20, 0  ;;  %s171_s22 = sand.u32 1, %s1199_s14  }
   0xc   : > { %s879_s23 = sshll.u32 %s1207_s16, 14  ;;  %s862_s25 = sshll.u32 %s171_s22, 10 }
   0xd   : > { %s1288_s24 = scalar_select %p61_p5, %s1199_s14, %s63_s19  }
   0xe   : > { %s179_s28 = scalar_lea.hbm %s1602_s1, %s879_s23  ;;  %p1293_p6 = pnand %p970_p4, %p72_p3 }
   0xf   : > { %s173_s30 = scalar_lea.vmem [#allocation6], %s862_s25  ;;  %s865_s5 = sshll.u32 %s171_s22, 9 }
  0x10   : > { %s180_s4 = sshll.u32 %s173_s30, 4  ;;  %s1297_s6 = scalar_lea.sflag [#allocation7], %s169_s21  ;;  %s181_s4 = int_to_ptr.vmem [resolvable:$true] %s180_s4 }
  0x11   : > { %p1049_p7 = pneg %p1293_p6  ;;  %s1060_s7 = scalar_lea.vmem %s181_s4, 16384 }
  0x12   : > { %p1061_p8 = scmp.ne.s32.totalorder %s181_s4, %s1060_s7  ;;  %s1213_s8 = smov [#allocation6]  }
  0x13   : > { %s1065_s9 = sshll.u32 %s1213_s8, 4  ;;  %s1066_s9 = int_to_ptr.vmem [resolvable:$false] %s1065_s9 }
  0x14   : > { %p1063_p9 = pnand %p1061_p8, %p1049_p7  ;;  %s1067_s10 = scalar_lea.vmem %s1066_s9, 32768 }
  0x15   : > { %p1068_p11 = scmp.lt.s32.totalorder %s181_s4, %s1066_s9  ;;  %p1069_p12 = scmp.lt.s32.totalorder %s1067_s10, %s1060_s7 }
  0x16   : > { %p1064_p10 = pneg %p1063_p9 }
  0x17   : > { %p1070_p13 = por %p1069_p12, %p1068_p11 }
  0x19   : > { %p1071_p0 = pnand %p1070_p13, %p1064_p10 }
  0x1b   : > { %1074 = shalt.err (!%p1071_p0)
}
  0x1c   : > { %s1214_s11 = smov 512   ;;  %s1215_s19 = smov 32  }
  0x1d   : > { %965 = dma.hbm_to_vmem [thread:$0]  (!%p1293_p6), %s179_s28, 16384, %s181_s4, %s1297_s6, %s1214_s11, %s1214_s11, %s1215_s19  }
  0x1e   : > { %s194_s20 = scalar_lea.vmem [#allocation8], %s865_s5  ;;  %s1308_s22 = sadd.s32 4294967295, %s1211_s17  }
  0x1f   : > { %s202_s21 = sshll.u32 %s194_s20, 4  ;;  %p76_p1 = scmp.ne.s32.totalorder %s1195_s13, %s1191_s12  ;;  %s203_s21 = int_to_ptr.vmem [resolvable:$true] %s202_s21 }
  0x20   : > { %p77_p2 = scmp.eq.s32.totalorder %s1308_s22, 0  ;;  %p859_p3 = scmp.ge.s32.totalorder %s1211_s17, 1 }
  0x21   : > { %p139_p4 = scmp.lt.s32.totalorder %s1211_s17, 3  ;;  %s1216_s26 = smov [#allocation3]  }
  0x22   : > { %p1317_p5 = por %p77_p2, %p76_p1  ;;  %s155_s27 = sshll.u32 %s1216_s26, 4  ;;  %s1325_s27 = int_to_ptr.vmem [resolvable:$true] %s155_s27 }
  0x23   : > { %p1321_p8 = pnand %p859_p3, %p139_p4  ;;  %s881_s12 = sshll.u32 %s1207_s16, 13 }
  0x24   : > { %s201_s5 = scalar_lea.hbm %s1603_s2, %s881_s12  ;;  %s1088_s7 = scalar_lea.vmem %s203_s21, 8192 }
  0x25   : > { %p958_p9 = pneg %p1321_p8  ;;  %p1089_p11 = scmp.ne.s32.totalorder %s203_s21, %s1088_s7 }
  0x26   : > { %s1217_s8 = smov [#allocation8]  }
  0x27   : > { %p1332_p10 = pnand %p958_p9, %p77_p2  ;;  %p1091_p12 = pnand %p1089_p11, %p1049_p7 }
  0x28   : > { %s1093_s9 = sshll.u32 %s1217_s8, 4  ;;  %s1094_s9 = int_to_ptr.vmem [resolvable:$false] %s1093_s9 }
  0x29   : > { %p1092_p13 = pneg %p1091_p12  ;;  %s1095_s10 = scalar_lea.vmem %s1094_s9, 16384 }
  0x2a   : > { %p1096_p0 = scmp.lt.s32.totalorder %s203_s21, %s1094_s9  ;;  %p1097_p1 = scmp.lt.s32.totalorder %s1095_s10, %s1088_s7 }
  0x2c   : > { %p1098_p3 = por %p1097_p1, %p1096_p0 }
  0x2e   : > { %p1099_p4 = pnand %p1098_p3, %p1092_p13 }
  0x30   : > { %1102 = shalt.err (!%p1099_p4)
}
  0x31   : > { %s1218_s11 = smov 256   ;;  %s1219_s19 = smov 16  }
  0x32   : > { %968 = dma.hbm_to_vmem [thread:$0]  (!%p1293_p6), %s201_s5, 8192, %s203_s21, %s1297_s6, %s1218_s11, %s1218_s11, %s1219_s19  }
  0x33   : > { %p1105_p7 = pneg %p1332_p10  ;;  %s1114_s20 = scalar_lea.vmem %s1325_s27, 512 }
  0x34   : > { %p1115_p9 = scmp.ne.s32.totalorder %s1325_s27, %s1114_s20  ;;  %p1122_p0 = scmp.lt.s32.totalorder %s1325_s27, %s1325_s27 }
  0x35   : > { %p1123_p13 = scmp.lt.s32.totalorder %s1114_s20, %s1114_s20 }
  0x36   : > { %p1117_p11 = pnand %p1115_p9, %p1105_p7 }
  0x37   : > { %p1124_p1 = por %p1123_p13, %p1122_p0 }
  0x38   : > { %p1118_p12 = pneg %p1117_p11 }
  0x3a   : > { %p1125_p3 = pnand %p1124_p1, %p1118_p12 }
  0x3c   : > { %1128 = shalt.err (!%p1125_p3)
}
  0x3d   : > { %961 = dma.hbm_to_vmem [thread:$0]  (!%p1332_p10), %s1601_s0, 512, %s1325_s27, [#allocation4], %s1218_s11, %s1218_s11, %s1219_s19  }
  0x3e   : > { %214 = sbr.rel (%p1321_p8) target bundleno = 607 (0x25f), region = 32 }
  0x43   : > { %1178 = dma.done.wait (%p77_p2), [#allocation4], 512  }
  0x44   : > { %1180 = vsyncadd (%p77_p2), [#allocation4], 4294966784  ;;  %s220_s29 = sand.u32 1, %s1308_s22   ;;  %s222_s6 = sand.u32 1, %s1195_s13  }
  0x45   : > { %s871_s21 = sshll.u32 %s222_s6, 10  ;;  %s221_s28 = scalar_lea.sflag [#allocation7], %s220_s29 }
  0x46   : > { %s1365_s30 = scalar_lea.vmem [#allocation6], %s871_s21 }
  0x47   : > { %1182 = dma.done.wait (%p1317_p5), %s221_s28, 24576  }
  0x48   : > { %1184 = vsyncadd (%p1317_p5), %s221_s28, 4294942720  ;;  %s872_s25 = sshll.u32 %s222_s6, 9  ;;  %p873_p6 = scmp.ne.s32.totalorder %s1203_s15, 0 }
  0x49   : > { %s1371_s27 = scalar_lea.vmem [#allocation8], %s872_s25 }
  0x4a   : > { %262 = sbr.rel (%p873_p6) target bundleno = 82 (0x52), region = 48 }
  0x4f   : > { %v1220_v0 = vmov 0.0  }
  0x50   : > { %263 = vst [vmem:[#allocation2 + $0x10] sm:$0xff] %v1220_v0  ;;  %264 = vst [vmem:[#allocation2] sm:$0xff] %v1220_v0 }
  0x51   : > { %265 = vst [vmem:[#allocation2 + $0x18] sm:$0xff] %v1220_v0  ;;  %266 = vst [vmem:[#allocation2 + $0x8] sm:$0xff] %v1220_v0 }
  0x52 PF: > { %v332_v1 = vld [vmem:[%s1365_s30 + $0x1e8] sm:$0xff]  ;;  %v331_v2 = vld [vmem:[%s1365_s30 + $0x1e0] sm:$0xff]  ;;  %v334_v15 = vld [vmem:[%s1365_s30 + $0x1f8] sm:$0xff]  ;;  %p874_p2 = scmp.ne.s32.totalorder %s1203_s15, 1 }
  0x53   : > { %v328_v3 = vld [vmem:[%s1365_s30 + $0x1c8] sm:$0xff]  ;;  %399 = vmatprep.subr.mxu0 %v332_v1  ;;  %v327_v4 = vld [vmem:[%s1365_s30 + $0x1c0] sm:$0xff]  ;;  %476 = vmatprep.subr.mxu1 %v334_v15  ;;  %v333_v17 = vld [vmem:[%s1365_s30 + $0x1f0] sm:$0xff] }
  0x54   : > { %400 = vmatpush1.msra.mxu0 %v331_v2  ;;  %v324_v5 = vld [vmem:[%s1365_s30 + $0x1a8] sm:$0xff]  ;;  %v323_v6 = vld [vmem:[%s1365_s30 + $0x1a0] sm:$0xff]  ;;  %477 = vmatpush1.msra.mxu1 %v333_v17  ;;  %v330_v19 = vld [vmem:[%s1365_s30 + $0x1d8] sm:$0xff] }
  0x55   : > { %401 = vmatprep.subr.mxu0 %v328_v3  ;;  %v320_v7 = vld [vmem:[%s1365_s30 + $0x188] sm:$0xff]  ;;  %v319_v8 = vld [vmem:[%s1365_s30 + $0x180] sm:$0xff]  ;;  %v329_v20 = vld [vmem:[%s1365_s30 + $0x1d0] sm:$0xff]  ;;  %478 = vmatprep.subr.mxu1 %v330_v19 }
  0x56   : > { %402 = vmatpush1.msra.mxu0 %v327_v4  ;;  %v316_v9 = vld [vmem:[%s1365_s30 + $0x168] sm:$0xff]  ;;  %v315_v10 = vld [vmem:[%s1365_s30 + $0x160] sm:$0xff]  ;;  %v326_v22 = vld [vmem:[%s1365_s30 + $0x1b8] sm:$0xff]  ;;  %479 = vmatpush1.msra.mxu1 %v329_v20 }
  0x57   : > { %403 = vmatprep.subr.mxu0 %v324_v5  ;;  %v312_v11 = vld [vmem:[%s1365_s30 + $0x148] sm:$0xff]  ;;  %v311_v12 = vld [vmem:[%s1365_s30 + $0x140] sm:$0xff]  ;;  %v325_v24 = vld [vmem:[%s1365_s30 + $0x1b0] sm:$0xff]  ;;  %480 = vmatprep.subr.mxu1 %v326_v22 }
  0x58   : > { %404 = vmatpush1.msra.mxu0 %v323_v6  ;;  %v308_v13 = vld [vmem:[%s1365_s30 + $0x128] sm:$0xff]  ;;  %v307_v14 = vld [vmem:[%s1365_s30 + $0x120] sm:$0xff]  ;;  %v322_v25 = vld [vmem:[%s1365_s30 + $0x198] sm:$0xff]  ;;  %481 = vmatpush1.msra.mxu1 %v325_v24 }
  0x59   : > { %405 = vmatprep.subr.mxu0 %v320_v7  ;;  %v304_v16 = vld [vmem:[%s1365_s30 + $0x108] sm:$0xff]  ;;  %v303_v18 = vld [vmem:[%s1365_s30 + $0x100] sm:$0xff]  ;;  %v321_v27 = vld [vmem:[%s1365_s30 + $0x190] sm:$0xff]  ;;  %482 = vmatprep.subr.mxu1 %v322_v25 }
  0x5a   : > { %406 = vmatpush1.msra.mxu0 %v319_v8  ;;  %v300_v21 = vld [vmem:[%s1365_s30 + $0xe8] sm:$0xff]  ;;  %v299_v23 = vld [vmem:[%s1365_s30 + $0xe0] sm:$0xff]  ;;  %v318_v29 = vld [vmem:[%s1365_s30 + $0x178] sm:$0xff]  ;;  %483 = vmatpush1.msra.mxu1 %v321_v27 }
  0x5b   : > { %407 = vmatprep.subr.mxu0 %v316_v9  ;;  %v296_v26 = vld [vmem:[%s1365_s30 + $0xc8] sm:$0xff]  ;;  %v295_v28 = vld [vmem:[%s1365_s30 + $0xc0] sm:$0xff]  ;;  %v317_v31 = vld [vmem:[%s1365_s30 + $0x170] sm:$0xff]  ;;  %484 = vmatprep.subr.mxu1 %v318_v29 }
  0x5c   : > { %408 = vmatpush1.msra.mxu0 %v315_v10  ;;  %v292_v30 = vld [vmem:[%s1365_s30 + $0xa8] sm:$0xff]  ;;  %v291_v32 = vld [vmem:[%s1365_s30 + $0xa0] sm:$0xff]  ;;  %v314_v33 = vld [vmem:[%s1365_s30 + $0x158] sm:$0xff]  ;;  %485 = vmatpush1.msra.mxu1 %v317_v31 }
  0x5d   : > { %409 = vmatprep.subr.mxu0 %v312_v11  ;;  %v288_v34 = vld [vmem:[%s1365_s30 + $0x88] sm:$0xff]  ;;  %v313_v35 = vld [vmem:[%s1365_s30 + $0x150] sm:$0xff]  ;;  %v287_v36 = vld [vmem:[%s1365_s30 + $0x80] sm:$0xff]  ;;  %486 = vmatprep.subr.mxu1 %v314_v33 }
  0x5e   : > { %410 = vmatpush1.msra.mxu0 %v311_v12  ;;  %v310_v37 = vld [vmem:[%s1365_s30 + $0x138] sm:$0xff]  ;;  %v284_v38 = vld [vmem:[%s1365_s30 + $0x68] sm:$0xff]  ;;  %v309_v39 = vld [vmem:[%s1365_s30 + $0x130] sm:$0xff]  ;;  %487 = vmatpush1.msra.mxu1 %v313_v35 }
  0x5f   : > { %411 = vmatprep.subr.mxu0 %v308_v13  ;;  %v283_v40 = vld [vmem:[%s1365_s30 + $0x60] sm:$0xff]  ;;  %v306_v41 = vld [vmem:[%s1365_s30 + $0x118] sm:$0xff]  ;;  %v280_v42 = vld [vmem:[%s1365_s30 + $0x48] sm:$0xff]  ;;  %488 = vmatprep.subr.mxu1 %v310_v37 }
  0x60   : > { %412 = vmatpush1.msra.mxu0 %v307_v14  ;;  %v305_v43 = vld [vmem:[%s1365_s30 + $0x110] sm:$0xff]  ;;  %v279_v44 = vld [vmem:[%s1365_s30 + $0x40] sm:$0xff]  ;;  %489 = vmatpush1.msra.mxu1 %v309_v39  ;;  %v302_v45 = vld [vmem:[%s1365_s30 + $0xf8] sm:$0xff] }
  0x61   : > { %413 = vmatprep.subr.mxu0 %v304_v16  ;;  %v276_v46 = vld [vmem:[%s1365_s30 + $0x28] sm:$0xff]  ;;  %490 = vmatprep.subr.mxu1 %v306_v41  ;;  %v301_v47 = vld [vmem:[%s1365_s30 + $0xf0] sm:$0xff]  ;;  %v275_v48 = vld [vmem:[%s1365_s30 + $0x20] sm:$0xff] }
  0x62   : > { %414 = vmatpush1.msra.mxu0 %v303_v18  ;;  %491 = vmatpush1.msra.mxu1 %v305_v43  ;;  %v298_v49 = vld [vmem:[%s1365_s30 + $0xd8] sm:$0xff]  ;;  %v272_v50 = vld [vmem:[%s1365_s30 + $0x8] sm:$0xff]  ;;  %v297_v51 = vld [vmem:[%s1365_s30 + $0xd0] sm:$0xff] }
  0x63   : > { %415 = vmatprep.subr.mxu0 %v300_v21  ;;  %492 = vmatprep.subr.mxu1 %v302_v45  ;;  %v271_v52 = vld [vmem:[%s1365_s30] sm:$0xff]  ;;  %v294_v53 = vld [vmem:[%s1365_s30 + $0xb8] sm:$0xff]  ;;  %v396_v54 = vld [vmem:[%s1365_s30 + $0x3e8] sm:$0xff] }
  0x64   : > { %416 = vmatpush1.msra.mxu0 %v299_v23  ;;  %493 = vmatpush1.msra.mxu1 %v301_v47  ;;  %v293_v55 = vld [vmem:[%s1365_s30 + $0xb0] sm:$0xff]  ;;  %v395_v56 = vld [vmem:[%s1365_s30 + $0x3e0] sm:$0xff]  ;;  %v290_v57 = vld [vmem:[%s1365_s30 + $0x98] sm:$0xff] }
  0x65   : > { %417 = vmatprep.subr.mxu0 %v296_v26  ;;  %494 = vmatprep.subr.mxu1 %v298_v49  ;;  %v392_v58 = vld [vmem:[%s1365_s30 + $0x3c8] sm:$0xff]  ;;  %v289_v59 = vld [vmem:[%s1365_s30 + $0x90] sm:$0xff]  ;;  %v391_v60 = vld [vmem:[%s1365_s30 + $0x3c0] sm:$0xff] }
  0x66   : > { %418 = vmatpush1.msra.mxu0 %v295_v28  ;;  %495 = vmatpush1.msra.mxu1 %v297_v51  ;;  %v286_v61 = vld [vmem:[%s1365_s30 + $0x78] sm:$0xff]  ;;  %v388_v62 = vld [vmem:[%s1365_s30 + $0x3a8] sm:$0xff]  ;;  %v285_v63 = vld [vmem:[%s1365_s30 + $0x70] sm:$0xff] }
  0x67   : > { %419 = vmatprep.subr.mxu0 %v292_v30  ;;  %496 = vmatprep.subr.mxu1 %v294_v53  ;;  %v387_v0 = vld [vmem:[%s1365_s30 + $0x3a0] sm:$0xff]  ;;  %v282_v1 = vld [vmem:[%s1365_s30 + $0x58] sm:$0xff]  ;;  %v384_v2 = vld [vmem:[%s1365_s30 + $0x388] sm:$0xff] }
  0x68   : > { %420 = vmatpush1.msra.mxu0 %v291_v32  ;;  %497 = vmatpush1.msra.mxu1 %v293_v55  ;;  %v281_v3 = vld [vmem:[%s1365_s30 + $0x50] sm:$0xff]  ;;  %v383_v4 = vld [vmem:[%s1365_s30 + $0x380] sm:$0xff]  ;;  %v278_v5 = vld [vmem:[%s1365_s30 + $0x38] sm:$0xff] }
  0x69   : > { %421 = vmatprep.subr.mxu0 %v288_v34  ;;  %498 = vmatprep.subr.mxu1 %v290_v57  ;;  %v380_v6 = vld [vmem:[%s1365_s30 + $0x368] sm:$0xff]  ;;  %v379_v8 = vld [vmem:[%s1365_s30 + $0x360] sm:$0xff]  ;;  %v277_v9 = vld [vmem:[%s1365_s30 + $0x30] sm:$0xff] }
  0x6a   : > { %422 = vmatpush1.msra.mxu0 %v287_v36  ;;  %499 = vmatpush1.msra.mxu1 %v289_v59  ;;  %v1444_v7 = vld [vmem:[#allocation3 + $0x8] sm:$0xff]  ;;  %v274_v11 = vld [vmem:[%s1365_s30 + $0x18] sm:$0xff]  ;;  %v375_v12 = vld [vmem:[%s1365_s30 + $0x340] sm:$0xff] }
  0x6b   : > { %423 = vmatprep.subr.mxu0 %v284_v38  ;;  %500 = vmatprep.subr.mxu1 %v286_v61  ;;  %v376_v10 = vld [vmem:[%s1365_s30 + $0x348] sm:$0xff]  ;;  %v273_v13 = vld [vmem:[%s1365_s30 + $0x10] sm:$0xff]  ;;  %v398_v15 = vld [vmem:[%s1365_s30 + $0x3f8] sm:$0xff] }
  0x6c   : > { %424 = vmatpush1.msra.mxu0 %v283_v40  ;;  %501 = vmatpush1.msra.mxu1 %v285_v63  ;;  %v372_v14 = vld [vmem:[%s1365_s30 + $0x328] sm:$0xff]  ;;  %v371_v16 = vld [vmem:[%s1365_s30 + $0x320] sm:$0xff]  ;;  %v397_v17 = vld [vmem:[%s1365_s30 + $0x3f0] sm:$0xff] }
  0x6d   : > { %425 = vmatprep.subr.mxu0 %v280_v42  ;;  %502 = vmatprep.subr.mxu1 %v282_v1  ;;  %v368_v18 = vld [vmem:[%s1365_s30 + $0x308] sm:$0xff]  ;;  %v394_v19 = vld [vmem:[%s1365_s30 + $0x3d8] sm:$0xff]  ;;  %v367_v20 = vld [vmem:[%s1365_s30 + $0x300] sm:$0xff] }
  0x6e   : > { %426 = vmatpush1.msra.mxu0 %v279_v44  ;;  %503 = vmatpush1.msra.mxu1 %v281_v3  ;;  %v393_v21 = vld [vmem:[%s1365_s30 + $0x3d0] sm:$0xff]  ;;  %v364_v22 = vld [vmem:[%s1365_s30 + $0x2e8] sm:$0xff]  ;;  %v390_v23 = vld [vmem:[%s1365_s30 + $0x3b8] sm:$0xff] }
  0x6f   : > { %427 = vmatprep.subr.mxu0 %v276_v46  ;;  %504 = vmatprep.subr.mxu1 %v278_v5  ;;  %v363_v24 = vld [vmem:[%s1365_s30 + $0x2e0] sm:$0xff]  ;;  %v389_v25 = vld [vmem:[%s1365_s30 + $0x3b0] sm:$0xff]  ;;  %v360_v26 = vld [vmem:[%s1365_s30 + $0x2c8] sm:$0xff] }
  0x70   : > { %428 = vmatpush1.msra.mxu0 %v275_v48  ;;  %463 = vmatprep.mubr.f32.mxu0 %v1444_v7  ;;  %v386_v27 = vld [vmem:[%s1365_s30 + $0x398] sm:$0xff]  ;;  %v359_v28 = vld [vmem:[%s1365_s30 + $0x2c0] sm:$0xff]  ;;  %v385_v29 = vld [vmem:[%s1365_s30 + $0x390] sm:$0xff] }
  0x71   : > { %429 = vmatprep.subr.mxu0 %v272_v50  ;;  %505 = vmatpush1.msra.mxu1 %v277_v9  ;;  %v356_v30 = vld [vmem:[%s1365_s30 + $0x2a8] sm:$0xff]  ;;  %v382_v31 = vld [vmem:[%s1365_s30 + $0x378] sm:$0xff]  ;;  %v355_v32 = vld [vmem:[%s1365_s30 + $0x2a0] sm:$0xff] }
  0x72   : > { %430 = vmatpush1.msra.mxu0 %v271_v52  ;;  %506 = vmatprep.subr.mxu1 %v274_v11  ;;  %v381_v33 = vld [vmem:[%s1365_s30 + $0x370] sm:$0xff]  ;;  %v352_v34 = vld [vmem:[%s1365_s30 + $0x288] sm:$0xff]  ;;  %v378_v35 = vld [vmem:[%s1365_s30 + $0x358] sm:$0xff] }
  0x73   : > { %431 = vmatprep.subr.mxu0 %v396_v54  ;;  %507 = vmatpush1.msra.mxu1 %v273_v13  ;;  %v351_v36 = vld [vmem:[%s1365_s30 + $0x280] sm:$0xff]  ;;  %v377_v37 = vld [vmem:[%s1365_s30 + $0x350] sm:$0xff]  ;;  %v348_v38 = vld [vmem:[%s1365_s30 + $0x268] sm:$0xff] }
  0x74   : > { %432 = vmatpush2.msra.mxu0 %v395_v56  ;;  %508 = vmatprep.subr.mxu1 %v398_v15  ;;  %v374_v39 = vld [vmem:[%s1365_s30 + $0x338] sm:$0xff]  ;;  %v347_v40 = vld [vmem:[%s1365_s30 + $0x260] sm:$0xff]  ;;  %v373_v41 = vld [vmem:[%s1365_s30 + $0x330] sm:$0xff] }
  0x75   : > { %433 = vmatprep.subr.mxu0 %v392_v58  ;;  %509 = vmatpush2.msra.mxu1 %v397_v17  ;;  %v344_v42 = vld [vmem:[%s1365_s30 + $0x248] sm:$0xff]  ;;  %v370_v43 = vld [vmem:[%s1365_s30 + $0x318] sm:$0xff]  ;;  %v343_v44 = vld [vmem:[%s1365_s30 + $0x240] sm:$0xff] }
  0x76   : > { %434 = vmatpush2.msra.mxu0 %v391_v60  ;;  %510 = vmatprep.subr.mxu1 %v394_v19  ;;  %v369_v45 = vld [vmem:[%s1365_s30 + $0x310] sm:$0xff]  ;;  %v340_v46 = vld [vmem:[%s1365_s30 + $0x228] sm:$0xff]  ;;  %v366_v47 = vld [vmem:[%s1365_s30 + $0x2f8] sm:$0xff] }
  0x77   : > { %435 = vmatprep.subr.mxu0 %v388_v62  ;;  %511 = vmatpush2.msra.mxu1 %v393_v21  ;;  %v339_v48 = vld [vmem:[%s1365_s30 + $0x220] sm:$0xff]  ;;  %v365_v49 = vld [vmem:[%s1365_s30 + $0x2f0] sm:$0xff]  ;;  %v336_v50 = vld [vmem:[%s1365_s30 + $0x208] sm:$0xff] }
  0x78   : > { %436 = vmatpush2.msra.mxu0 %v387_v0  ;;  %512 = vmatprep.subr.mxu1 %v390_v23  ;;  %v362_v51 = vld [vmem:[%s1365_s30 + $0x2d8] sm:$0xff]  ;;  %v335_v52 = vld [vmem:[%s1365_s30 + $0x200] sm:$0xff]  ;;  %v361_v53 = vld [vmem:[%s1365_s30 + $0x2d0] sm:$0xff] }
  0x79   : > { %437 = vmatprep.subr.mxu0 %v384_v2  ;;  %513 = vmatpush2.msra.mxu1 %v389_v25  ;;  %v267_v54 = vld [vmem:[#allocation3] sm:$0xff]  ;;  %v358_v55 = vld [vmem:[%s1365_s30 + $0x2b8] sm:$0xff]  ;;  %v357_v57 = vld [vmem:[%s1365_s30 + $0x2b0] sm:$0xff] }
  0x7a   : > { %438 = vmatpush2.msra.mxu0 %v383_v4  ;;  %514 = vmatprep.subr.mxu1 %v386_v27  ;;  %v270_v56 = vld [vmem:[#allocation3 + $0x18] sm:$0xff]  ;;  %v353_v59 = vld [vmem:[%s1365_s30 + $0x290] sm:$0xff]  ;;  %v618_v2 = vld [vmem:[%s1371_s27 + $0xe8] sm:$0xff] }
  0x7b   : > { %439 = vmatprep.subr.mxu0 %v380_v6  ;;  %515 = vmatpush2.msra.mxu1 %v385_v29  ;;  %v354_v58 = vld [vmem:[%s1365_s30 + $0x298] sm:$0xff]  ;;  %v269_v61 = vld [vmem:[#allocation3 + $0x10] sm:$0xff]  ;;  %v617_v4 = vld [vmem:[%s1371_s27 + $0xe0] sm:$0xff] }
  0x7c   : > { %440 = vmatpush2.msra.mxu0 %v379_v8  ;;  %516 = vmatprep.subr.mxu1 %v382_v31  ;;  %v620_v60 = vld [vmem:[%s1371_s27 + $0xf8] sm:$0xff]  ;;  %v349_v63 = vld [vmem:[%s1365_s30 + $0x270] sm:$0xff]  ;;  %v610_v15 = vld [vmem:[%s1371_s27 + $0xa8] sm:$0xff] }
  0x7d   : > { %441 = vmatprep.subr.mxu0 %v376_v10  ;;  %517 = vmatpush2.msra.mxu1 %v381_v33  ;;  %v350_v62 = vld [vmem:[%s1365_s30 + $0x278] sm:$0xff]  ;;  %v619_v0 = vld [vmem:[%s1371_s27 + $0xf0] sm:$0xff]  ;;  %v614_v10 = vld [vmem:[%s1371_s27 + $0xc8] sm:$0xff] }
  0x7e   : > { %442 = vmatpush2.msra.mxu0 %v375_v12  ;;  %518 = vmatprep.subr.mxu1 %v378_v35  ;;  %v346_v1 = vld [vmem:[%s1365_s30 + $0x258] sm:$0xff]  ;;  %v345_v3 = vld [vmem:[%s1365_s30 + $0x250] sm:$0xff]  ;;  %v613_v12 = vld [vmem:[%s1371_s27 + $0xc0] sm:$0xff] }
  0x7f   : > { %443 = vmatprep.subr.mxu0 %v372_v14  ;;  %519 = vmatpush2.msra.mxu1 %v377_v37  ;;  %v342_v5 = vld [vmem:[%s1365_s30 + $0x238] sm:$0xff]  ;;  %v615_v8 = vld [vmem:[%s1371_s27 + $0xd0] sm:$0xff]  ;;  %v606_v19 = vld [vmem:[%s1371_s27 + $0x88] sm:$0xff] }
  0x80   : > { %444 = vmatpush2.msra.mxu0 %v371_v16  ;;  %520 = vmatprep.subr.mxu1 %v374_v39  ;;  %v616_v6 = vld [vmem:[%s1371_s27 + $0xd8] sm:$0xff]  ;;  %v337_v11 = vld [vmem:[%s1365_s30 + $0x210] sm:$0xff]  ;;  %v609_v16 = vld [vmem:[%s1371_s27 + $0xa0] sm:$0xff] }
  0x81   : > { %445 = vmatprep.subr.mxu0 %v368_v18  ;;  %521 = vmatpush2.msra.mxu1 %v373_v41  ;;  %v338_v9 = vld [vmem:[%s1365_s30 + $0x218] sm:$0xff]  ;;  %v611_v14 = vld [vmem:[%s1371_s27 + $0xb0] sm:$0xff]  ;;  %v602_v23 = vld [vmem:[%s1371_s27 + $0x68] sm:$0xff] }
  0x82   : > { %446 = vmatpush2.msra.mxu0 %v367_v20  ;;  %522 = vmatprep.subr.mxu1 %v370_v43  ;;  %v612_v13 = vld [vmem:[%s1371_s27 + $0xb8] sm:$0xff]  ;;  %v607_v18 = vld [vmem:[%s1371_s27 + $0x90] sm:$0xff]  ;;  %v605_v20 = vld [vmem:[%s1371_s27 + $0x80] sm:$0xff] }
  0x83   : > { %447 = vmatprep.subr.mxu0 %v364_v22  ;;  %523 = vmatpush2.msra.mxu1 %v369_v45  ;;  %v608_v17 = vld [vmem:[%s1371_s27 + $0x98] sm:$0xff]  ;;  %v603_v22 = vld [vmem:[%s1371_s27 + $0x70] sm:$0xff]  ;;  %v598_v27 = vld [vmem:[%s1371_s27 + $0x48] sm:$0xff] }
  0x84   : > { %448 = vmatpush2.msra.mxu0 %v363_v24  ;;  %524 = vmatprep.subr.mxu1 %v366_v47  ;;  %v604_v21 = vld [vmem:[%s1371_s27 + $0x78] sm:$0xff]  ;;  %v601_v24 = vld [vmem:[%s1371_s27 + $0x60] sm:$0xff]  ;;  %v594_v31 = vld [vmem:[%s1371_s27 + $0x28] sm:$0xff] }
  0x85   : > { %449 = vmatprep.subr.mxu0 %v360_v26  ;;  %525 = vmatpush2.msra.mxu1 %v365_v49  ;;  %v600_v25 = vld [vmem:[%s1371_s27 + $0x58] sm:$0xff]  ;;  %v599_v26 = vld [vmem:[%s1371_s27 + $0x50] sm:$0xff]  ;;  %v590_v35 = vld [vmem:[%s1371_s27 + $0x8] sm:$0xff] }
  0x86   : > { %450 = vmatpush2.msra.mxu0 %v359_v28  ;;  %526 = vmatprep.subr.mxu1 %v362_v51  ;;  %v597_v28 = vld [vmem:[%s1371_s27 + $0x40] sm:$0xff]  ;;  %v596_v29 = vld [vmem:[%s1371_s27 + $0x38] sm:$0xff]  ;;  %v650_v39 = vld [vmem:[%s1371_s27 + $0x1e8] sm:$0xff] }
  0x87   : > { %451 = vmatprep.subr.mxu0 %v356_v30  ;;  %527 = vmatpush2.msra.mxu1 %v361_v53  ;;  %v595_v30 = vld [vmem:[%s1371_s27 + $0x30] sm:$0xff]  ;;  %v592_v33 = vld [vmem:[%s1371_s27 + $0x18] sm:$0xff]  ;;  %v646_v43 = vld [vmem:[%s1371_s27 + $0x1c8] sm:$0xff] }
  0x88   : > { %452 = vmatpush2.msra.mxu0 %v355_v32  ;;  %528 = vmatprep.subr.mxu1 %v358_v55  ;;  %v593_v32 = vld [vmem:[%s1371_s27 + $0x20] sm:$0xff]  ;;  %v652_v37 = vld [vmem:[%s1371_s27 + $0x1f8] sm:$0xff]  ;;  %v642_v47 = vld [vmem:[%s1371_s27 + $0x1a8] sm:$0xff] }
  0x89   : > { %453 = vmatprep.subr.mxu0 %v352_v34  ;;  %529 = vmatpush2.msra.mxu1 %v357_v57  ;;  %v591_v34 = vld [vmem:[%s1371_s27 + $0x10] sm:$0xff]  ;;  %v648_v41 = vld [vmem:[%s1371_s27 + $0x1d8] sm:$0xff]  ;;  %v638_v51 = vld [vmem:[%s1371_s27 + $0x188] sm:$0xff] }
  0x8a   : > { %454 = vmatpush2.msra.mxu0 %v351_v36  ;;  %530 = vmatprep.subr.mxu1 %v354_v58  ;;  %v589_v36 = vld [vmem:[%s1371_s27] sm:$0xff]  ;;  %v644_v45 = vld [vmem:[%s1371_s27 + $0x1b8] sm:$0xff]  ;;  %v634_v55 = vld [vmem:[%s1371_s27 + $0x168] sm:$0xff] }
  0x8b   : > { %455 = vmatprep.subr.mxu0 %v348_v38  ;;  %540 = vmatprep.mubr.f32.mxu1 %v1444_v7  ;;  %v341_v7 = vld [vmem:[%s1365_s30 + $0x230] sm:$0xff]  ;;  %v640_v49 = vld [vmem:[%s1371_s27 + $0x198] sm:$0xff] }
  0x8c   : > { %456 = vmatpush2.msra.mxu0 %v347_v40  ;;  %531 = vmatpush2.msra.mxu1 %v353_v59  ;;  %v651_v38 = vld [vmem:[%s1371_s27 + $0x1f0] sm:$0xff]  ;;  %v649_v40 = vld [vmem:[%s1371_s27 + $0x1e0] sm:$0xff]  ;;  %v636_v53 = vld [vmem:[%s1371_s27 + $0x178] sm:$0xff] }
  0x8d   : > { %457 = vmatprep.subr.mxu0 %v344_v42  ;;  %532 = vmatprep.subr.mxu1 %v350_v62  ;;  %v647_v42 = vld [vmem:[%s1371_s27 + $0x1d0] sm:$0xff]  ;;  %v632_v57 = vld [vmem:[%s1371_s27 + $0x158] sm:$0xff]  ;;  %v630_v59 = vld [vmem:[%s1371_s27 + $0x148] sm:$0xff] }
  0x8e   : > { %458 = vmatpush2.msra.mxu0 %v343_v44  ;;  %533 = vmatpush2.msra.mxu1 %v349_v63  ;;  %v645_v44 = vld [vmem:[%s1371_s27 + $0x1c0] sm:$0xff]  ;;  %v631_v58 = vld [vmem:[%s1371_s27 + $0x150] sm:$0xff]  ;;  %v626_v63 = vld [vmem:[%s1371_s27 + $0x128] sm:$0xff] }
  0x8f   : > { %459 = vmatprep.subr.mxu0 %v340_v46  ;;  %534 = vmatprep.subr.mxu1 %v346_v1  ;;  %v643_v46 = vld [vmem:[%s1371_s27 + $0x1b0] sm:$0xff]  ;;  %v624_v1 = vld [vmem:[%s1371_s27 + $0x118] sm:$0xff] }
  0x90   : > { %460 = vmatpush2.msra.mxu0 %v339_v48  ;;  %535 = vmatpush2.msra.mxu1 %v345_v3  ;;  %v641_v48 = vld [vmem:[%s1371_s27 + $0x1a0] sm:$0xff]  ;;  %v627_v62 = vld [vmem:[%s1371_s27 + $0x130] sm:$0xff]  ;;  %v622_v3 = vld [vmem:[%s1371_s27 + $0x108] sm:$0xff] }
  0x91   : > { %461 = vmatprep.subr.mxu0 %v336_v50  ;;  %536 = vmatprep.subr.mxu1 %v342_v5  ;;  %v639_v50 = vld [vmem:[%s1371_s27 + $0x190] sm:$0xff] }
  0x92   : > { %462 = vmatpush2.msra.mxu0 %v335_v52  ;;  %537 = vmatpush2.msra.mxu1 %v341_v7  ;;  %v637_v52 = vld [vmem:[%s1371_s27 + $0x180] sm:$0xff] }
  0x93   : > { %464 = vmatmul.mubr.f32.vlgmr.msra.gmra.mxu0 %v267_v54  ;;  %653 = vmatprep.subr.mxu0 %v620_v60 }
  0x94   : > { %469 = vmatprep.mubr.f32.mxu0 %v270_v56  ;;  %654 = vmatpush1.msra.mxu0 %v619_v0 }
  0x95   : > { %655 = vmatprep.subr.mxu0 %v618_v2  ;;  %538 = vmatprep.subr.mxu1 %v338_v9 }
  0x96   : > { %656 = vmatpush1.msra.mxu0 %v617_v4  ;;  %539 = vmatpush2.msra.mxu1 %v337_v11 }
  0x97   : > { %470 = vmatmul.mubr.f32.gmra.mxu0 %v269_v61  ;;  %657 = vmatprep.subr.mxu0 %v616_v6 }
  0x98   : > { %658 = vmatpush1.msra.mxu0 %v615_v8  ;;  %541 = vmatmul.mubr.f32.vlgmr.msra.gmra.mxu1 %v267_v54  ;;  %v635_v54 = vld [vmem:[%s1371_s27 + $0x170] sm:$0xff] }
  0x99   : > { %659 = vmatprep.subr.mxu0 %v614_v10  ;;  %882 = vmatprep.subr.mxu1 %v620_v60  ;;  %v629_v60 = vld [vmem:[%s1371_s27 + $0x140] sm:$0xff] }
  0x9a   : > { %660 = vmatpush1.msra.mxu0 %v613_v12  ;;  %546 = vmatprep.mubr.f32.mxu1 %v270_v56  ;;  %v633_v56 = vld [vmem:[%s1371_s27 + $0x160] sm:$0xff] }
  0x9b   : > { %914 = vmatpush1.msra.mxu1 %v619_v0  ;;  %661 = vmatprep.subr.mxu0 %v612_v13  ;;  %v625_v0 = vld [vmem:[%s1371_s27 + $0x120] sm:$0xff] }
  0x9c   : > { %883 = vmatprep.subr.mxu1 %v618_v2  ;;  %662 = vmatpush1.msra.mxu0 %v611_v14  ;;  %v623_v2 = vld [vmem:[%s1371_s27 + $0x110] sm:$0xff] }
  0x9d   : > { %915 = vmatpush1.msra.mxu1 %v617_v4  ;;  %663 = vmatprep.subr.mxu0 %v610_v15  ;;  %v621_v4 = vld [vmem:[%s1371_s27 + $0x100] sm:$0xff] }
  0x9e   : > { %547 = vmatmul.mubr.f32.gmra.mxu1 %v269_v61  ;;  %884 = vmatprep.subr.mxu1 %v616_v6  ;;  %v628_v61 = vld [vmem:[%s1371_s27 + $0x138] sm:$0xff] }
  0x9f   : > { %916 = vmatpush1.msra.mxu1 %v615_v8  ;;  %664 = vmatpush1.msra.mxu0 %v609_v16 }
  0xa0   : > { %885 = vmatprep.subr.mxu1 %v614_v10  ;;  %665 = vmatprep.subr.mxu0 %v608_v17 }
  0xa1   : > { %917 = vmatpush1.msra.mxu1 %v613_v12  ;;  %666 = vmatpush1.msra.mxu0 %v607_v18 }
  0xa2   : > { %886 = vmatprep.subr.mxu1 %v612_v13  ;;  %667 = vmatprep.subr.mxu0 %v606_v19 }
  0xa3   : > { %918 = vmatpush1.msra.mxu1 %v611_v14  ;;  %668 = vmatpush1.msra.mxu0 %v605_v20 }
  0xa4   : > { %887 = vmatprep.subr.mxu1 %v610_v15  ;;  %669 = vmatprep.subr.mxu0 %v604_v21 }
  0xa5   : > { %919 = vmatpush1.msra.mxu1 %v609_v16  ;;  %670 = vmatpush1.msra.mxu0 %v603_v22 }
  0xa6   : > { %888 = vmatprep.subr.mxu1 %v608_v17  ;;  %671 = vmatprep.subr.mxu0 %v602_v23 }
  0xa7   : > { %920 = vmatpush1.msra.mxu1 %v607_v18  ;;  %672 = vmatpush1.msra.mxu0 %v601_v24 }
  0xa8   : > { %889 = vmatprep.subr.mxu1 %v606_v19  ;;  %673 = vmatprep.subr.mxu0 %v600_v25 }
  0xa9   : > { %921 = vmatpush1.msra.mxu1 %v605_v20  ;;  %674 = vmatpush1.msra.mxu0 %v599_v26 }
  0xaa   : > { %890 = vmatprep.subr.mxu1 %v604_v21  ;;  %675 = vmatprep.subr.mxu0 %v598_v27 }
  0xab   : > { %922 = vmatpush1.msra.mxu1 %v603_v22  ;;  %676 = vmatpush1.msra.mxu0 %v597_v28 }
  0xac   : > { %891 = vmatprep.subr.mxu1 %v602_v23  ;;  %677 = vmatprep.subr.mxu0 %v596_v29 }
  0xad   : > { %923 = vmatpush1.msra.mxu1 %v601_v24  ;;  %678 = vmatpush1.msra.mxu0 %v595_v30 }
  0xae   : > { %892 = vmatprep.subr.mxu1 %v600_v25  ;;  %679 = vmatprep.subr.mxu0 %v594_v31 }
  0xaf   : > { %924 = vmatpush1.msra.mxu1 %v599_v26  ;;  %680 = vmatpush1.msra.mxu0 %v593_v32 }
  0xb0   : > { %893 = vmatprep.subr.mxu1 %v598_v27  ;;  %681 = vmatprep.subr.mxu0 %v592_v33 }
  0xb1   : > { %925 = vmatpush1.msra.mxu1 %v597_v28  ;;  %682 = vmatpush1.msra.mxu0 %v591_v34 }
  0xb2   : > { %894 = vmatprep.subr.mxu1 %v596_v29  ;;  %683 = vmatprep.subr.mxu0 %v590_v35 }
  0xb3   : > { %926 = vmatpush1.msra.mxu1 %v595_v30  ;;  %684 = vmatpush1.msra.mxu0 %v589_v36 }
  0xb4   : > { %895 = vmatprep.subr.mxu1 %v594_v31  ;;  %685 = vmatprep.subr.mxu0 %v652_v37 }
  0xb5   : > { %927 = vmatpush1.msra.mxu1 %v593_v32  ;;  %686 = vmatpush2.msra.mxu0 %v651_v38 }
  0xb6   : > { %896 = vmatprep.subr.mxu1 %v592_v33  ;;  %687 = vmatprep.subr.mxu0 %v650_v39 }
  0xb7   : > { %928 = vmatpush1.msra.mxu1 %v591_v34  ;;  %688 = vmatpush2.msra.mxu0 %v649_v40 }
  0xb8   : > { %897 = vmatprep.subr.mxu1 %v590_v35  ;;  %689 = vmatprep.subr.mxu0 %v648_v41 }
  0xb9   : > { %929 = vmatpush1.msra.mxu1 %v589_v36  ;;  %690 = vmatpush2.msra.mxu0 %v647_v42 }
  0xba   : > { %898 = vmatprep.subr.mxu1 %v652_v37  ;;  %691 = vmatprep.subr.mxu0 %v646_v43 }
  0xbb   : > { %930 = vmatpush2.msra.mxu1 %v651_v38  ;;  %692 = vmatpush2.msra.mxu0 %v645_v44 }
  0xbc   : > { %899 = vmatprep.subr.mxu1 %v650_v39  ;;  %693 = vmatprep.subr.mxu0 %v644_v45 }
  0xbd   : > { %931 = vmatpush2.msra.mxu1 %v649_v40  ;;  %694 = vmatpush2.msra.mxu0 %v643_v46 }
  0xbe   : > { %900 = vmatprep.subr.mxu1 %v648_v41  ;;  %695 = vmatprep.subr.mxu0 %v642_v47  ;;  %v585_v41 = vld [vmem:[#allocation2 + $0x10] sm:$0xff] }
  0xbf   : > { %932 = vmatpush2.msra.mxu1 %v647_v42  ;;  %696 = vmatpush2.msra.mxu0 %v641_v48 }
  0xc0   : > { %901 = vmatprep.subr.mxu1 %v646_v43  ;;  %697 = vmatprep.subr.mxu0 %v640_v49  ;;  %v586_v43 = vld [vmem:[#allocation2] sm:$0xff] }
  0xc1   : > { %933 = vmatpush2.msra.mxu1 %v645_v44  ;;  %698 = vmatpush2.msra.mxu0 %v639_v50 }
  0xc2   : > { %902 = vmatprep.subr.mxu1 %v644_v45  ;;  %699 = vmatprep.subr.mxu0 %v638_v51 }
  0xc3   : > { %934 = vmatpush2.msra.mxu1 %v643_v46  ;;  %700 = vmatpush2.msra.mxu0 %v637_v52  ;;  %v587_v46 = vld [vmem:[#allocation2 + $0x18] sm:$0xff] }
  0xc4   : > { %903 = vmatprep.subr.mxu1 %v642_v47  ;;  %701 = vmatprep.subr.mxu0 %v636_v53 }
  0xc5   : > { %935 = vmatpush2.msra.mxu1 %v641_v48  ;;  %702 = vmatpush2.msra.mxu0 %v635_v54 }
  0xc6   : > { %904 = vmatprep.subr.mxu1 %v640_v49  ;;  %703 = vmatprep.subr.mxu0 %v634_v55  ;;  %v588_v49 = vld [vmem:[#allocation2 + $0x8] sm:$0xff] }
  0xc7   : > { %936 = vmatpush2.msra.mxu1 %v639_v50  ;;  %704 = vmatpush2.msra.mxu0 %v633_v56 }
  0xc8   : > { %905 = vmatprep.subr.mxu1 %v638_v51  ;;  %705 = vmatprep.subr.mxu0 %v632_v57 }
  0xc9   : > { %937 = vmatpush2.msra.mxu1 %v637_v52  ;;  %706 = vmatpush2.msra.mxu0 %v631_v58 }
  0xca   : > { %906 = vmatprep.subr.mxu1 %v636_v53  ;;  %707 = vmatprep.subr.mxu0 %v630_v59 }
  0xcb   : > { %938 = vmatpush2.msra.mxu1 %v635_v54  ;;  %708 = vmatpush2.msra.mxu0 %v629_v60 }
  0xcc   : > { %907 = vmatprep.subr.mxu1 %v634_v55  ;;  %709 = vmatprep.subr.mxu0 %v628_v61 }
  0xcd   : > { %939 = vmatpush2.msra.mxu1 %v633_v56  ;;  %710 = vmatpush2.msra.mxu0 %v627_v62 }
  0xce   : > { %908 = vmatprep.subr.mxu1 %v632_v57  ;;  %711 = vmatprep.subr.mxu0 %v626_v63 }
  0xcf   : > { %940 = vmatpush2.msra.mxu1 %v631_v58  ;;  %712 = vmatpush2.msra.mxu0 %v625_v0 }
  0xd0   : > { %909 = vmatprep.subr.mxu1 %v630_v59  ;;  %713 = vmatprep.subr.mxu0 %v624_v1 }
  0xd1   : > { %941 = vmatpush2.msra.mxu1 %v629_v60  ;;  %714 = vmatpush2.msra.mxu0 %v623_v2 }
  0xd2   : > { %910 = vmatprep.subr.mxu1 %v628_v61  ;;  %715 = vmatprep.subr.mxu0 %v622_v3 }
  0xd3   : > { %942 = vmatpush2.msra.mxu1 %v627_v62  ;;  %716 = vmatpush2.msra.mxu0 %v621_v4 }
  0xd4   : > { %911 = vmatprep.subr.mxu1 %v626_v63 }
  0xd5   : > { %943 = vmatpush2.msra.mxu1 %v625_v0 }
  0xd6   : > { %912 = vmatprep.subr.mxu1 %v624_v1 }
  0xd7   : > { %944 = vmatpush2.msra.mxu1 %v623_v2 }
  0xd8   : > { %913 = vmatprep.subr.mxu1 %v622_v3 }
  0xd9   : > { %945 = vmatpush2.msra.mxu1 %v621_v4 }
 0x153   : > { %v465_v5 = vpop.f32.mrf.mxu0 }
 0x154   : > { %v553_v6 = vsub.f32 0.0, %v465_v5 }
 0x155   : > { %v467_v7 = vpop.f32.mrf.mxu0 }
 0x156   : > { %v557_v8 = vmul.f32 1.442695, %v553_v6  ;;  %v554_v9 = vsub.f32 0.0, %v467_v7 }
 0x157   : > { %v471_v10 = vpop.f32.mrf.mxu0 }
 0x158   : > { %1031 = vpow2.f32 %v557_v8  ;;  %v559_v11 = vmul.f32 1.442695, %v554_v9  ;;  %v555_v12 = vsub.f32 0.0, %v471_v10  ;;  %v542_v25 = vpop.f32.mrf.mxu1 }
 0x159   : > { %v473_v13 = vpop.f32.mrf.mxu0 }
 0x15a   : > { %1033 = vpow2.f32 %v559_v11  ;;  %v561_v14 = vmul.f32 1.442695, %v555_v12  ;;  %v556_v15 = vsub.f32 0.0, %v473_v13  ;;  %v544_v27 = vpop.f32.mrf.mxu1 }
 0x15c   : > { %1035 = vpow2.f32 %v561_v14  ;;  %v563_v16 = vmul.f32 1.442695, %v556_v15 }
 0x15e   : > { %1037 = vpow2.f32 %v563_v16  ;;  %v548_v32 = vpop.f32.mrf.mxu1 }
 0x160   : > { %v550_v38 = vpop.f32.mrf.mxu1 }
 0x165   : > { %v1032_v17 = vpop.eup %1031 }
 0x166   : > { %v565_v18 = vadd.f32 1.0, %v1032_v17 }
 0x167   : > { %v1034_v19 = vpop.eup %1033 }
 0x168   : > { %1039 = vrcp.f32 %v565_v18  ;;  %v566_v20 = vadd.f32 1.0, %v1034_v19 }
 0x169   : > { %v1036_v21 = vpop.eup %1035 }
 0x16a   : > { %1041 = vrcp.f32 %v566_v20  ;;  %v567_v22 = vadd.f32 1.0, %v1036_v21 }
 0x16b   : > { %v1038_v23 = vpop.eup %1037 }
 0x16c   : > { %1043 = vrcp.f32 %v567_v22  ;;  %v568_v24 = vadd.f32 1.0, %v1038_v23 }
 0x16e   : > { %1045 = vrcp.f32 %v568_v24 }
 0x175   : > { %v1040_v26 = vpop.eup %1039 }
 0x176   : > { %v577_v29 = vmul.f32 %v1040_v26, %v465_v5 }
 0x177   : > { %v1042_v28 = vpop.eup %1041 }
 0x178   : > { %v578_v30 = vmul.f32 %v1042_v28, %v467_v7  ;;  %v581_v36 = vmul.f32 %v577_v29, %v542_v25 }
 0x179   : > { %v1044_v31 = vpop.eup %1043 }
 0x17a   : > { %v582_v33 = vmul.f32 %v578_v30, %v544_v27  ;;  %v579_v35 = vmul.f32 %v1044_v31, %v471_v10 }
 0x17b   : > { %v1046_v34 = vpop.eup %1045 }
 0x17c   : > { %v580_v37 = vmul.f32 %v1046_v34, %v473_v13  ;;  %717 = vmatprep.mubr.f32.mxu0 %v582_v33  ;;  %v583_v40 = vmul.f32 %v579_v35, %v548_v32 }
 0x17d   : > { %718 = vmatmul.mubr.f32.vlgmr.msra.gmra.mxu0 %v581_v36 }
 0x17e   : > { %v584_v39 = vmul.f32 %v580_v37, %v550_v38 }
 0x180   : > { %723 = vmatprep.mubr.f32.mxu1 %v584_v39 }
 0x181   : > { %724 = vmatmul.mubr.f32.vlgmr.msra.gmra.mxu1 %v583_v40 }
 0x23d   : > { %v719_v42 = vpop.f32.mrf.mxu0 }
 0x23e   : > { %v730_v44 = vadd.f32 %v719_v42, %v585_v41 }
 0x23f   : > { %v721_v45 = vpop.f32.mrf.mxu0 }
 0x240   : > { %734 = vst [vmem:[#allocation2 + $0x10] sm:$0xff] %v730_v44  ;;  %v731_v47 = vadd.f32 %v721_v45, %v586_v43 }
 0x241   : > { %v725_v48 = vpop.f32.mrf.mxu1 }
 0x242   : > { %735 = vst [vmem:[#allocation2] sm:$0xff] %v731_v47  ;;  %v732_v50 = vadd.f32 %v725_v48, %v587_v46  ;;  %741 = sbr.rel (%p874_p2) target bundleno = 591 (0x24f), region = 52 }
 0x243   : > { %v727_v51 = vpop.f32.mrf.mxu1 }
 0x244   : > { %736 = vst [vmem:[#allocation2 + $0x18] sm:$0xff] %v732_v50  ;;  %v733_v52 = vadd.f32 %v727_v51, %v588_v49 }
 0x246   : > { %737 = vst [vmem:[#allocation2 + $0x8] sm:$0xff] %v733_v52 }
 0x247   : > { %v742_v53 = vld [vmem:[#allocation2 + $0x10] sm:$0xff] }
 0x248   : > { %746 = vst [vmem:[#allocation9] sm:$0xff] %v742_v53 }
 0x249   : > { %v743_v54 = vld [vmem:[#allocation2] sm:$0xff] }
 0x24a   : > { %747 = vst [vmem:[#allocation9 + $0x8] sm:$0xff] %v743_v54 }
 0x24b   : > { %v744_v55 = vld [vmem:[#allocation2 + $0x18] sm:$0xff] }
 0x24c   : > { %748 = vst [vmem:[#allocation9 + $0x10] sm:$0xff] %v744_v55 }
 0x24d   : > { %v745_v56 = vld [vmem:[#allocation2 + $0x8] sm:$0xff] }
 0x24e   : > { %749 = vst [vmem:[#allocation9 + $0x18] sm:$0xff] %v745_v56 }
 0x24f PF: > { %p972_p5 = scmp.eq.s32.totalorder %s1308_s22, 1  ;;  %s1221_s23 = smov [#allocation9]  }
 0x250   : > { %s760_s4 = sshll.u32 %s1221_s23, 4  ;;  %s761_s4 = int_to_ptr.vmem [resolvable:$true] %s760_s4 }
 0x251   : > { %s1129_s5 = scalar_lea.vmem %s761_s4, 512  ;;  %p1136_p7 = scmp.lt.s32.totalorder %s761_s4, %s761_s4 }
 0x252   : > { %p1130_p8 = scmp.ne.s32.totalorder %s761_s4, %s1129_s5  ;;  %p1137_p9 = scmp.lt.s32.totalorder %s1129_s5, %s1129_s5 }
 0x254   : > { %p1131_p10 = pnand %p1130_p8, %p972_p5  ;;  %p1138_p11 = por %p1137_p9, %p1136_p7 }
 0x256   : > { %p1132_p4 = pneg %p1131_p10 }
 0x258   : > { %p1139_p12 = pnand %p1138_p11, %p1132_p4 }
 0x25a   : > { %1142 = shalt.err (!%p1139_p12)
}
 0x25b   : > { %s1222_s15 = smov 256   ;;  %s1223_s7 = smov 16  }
 0x25c   : > { %955 = dma.vmem_to_hbm [thread:$0]  (%p972_p5), %s761_s4, 512, %s1604_s3, [#allocation5], %s1222_s15, %s1222_s15, %s1223_s7  }
 0x25d   : > { %1186 = dma.done.wait (%p972_p5), [#allocation5], 512  }
 0x25e   : > { %1188 = vsyncadd (%p972_p5), [#allocation5], 4294966784 }
 0x25f PF: > { %s18_s17 = sadd.s32 1, %s1211_s17   ;;  %s1609_s12 = smov %s1195_s13 }
 0x260   : > { %p15_p0 = scmp.ge.s32.totalorder %s18_s17, 4   ;;  %s1610_s13 = smov %s1199_s14 }
 0x261   : > { %s1611_s14 = smov %s1288_s24  ;;  %s1612_s15 = smov %s1207_s16 }
 0x262   : > { %s1613_s16 = smov %s1615_s18  ;;  %17 = sbr.rel (!%p15_p0) target bundleno = 6 (0x6), region = 95 }
 0x267   :  { %776 = vsyncpa [#allocation4], 1 }
 0x268   :  { %778 = vsyncpa [#allocation4 + $0x1], 1 }
 0x269   :  { %779 = vsyncpa [#allocation7], 1 }
 0x26a   :  { %781 = vsyncpa [#allocation7 + $0x1], 1 }
 0x26b   :  { %782 = vsyncpa [#allocation5], 1 }
 0x26c   :  { %784 = vsyncpa [#allocation5 + $0x1], 1 }

</bundles_post_ra>
